<compile_context>
chip_gen: v7x
topology: tpu7x:2x2x1
jax: 0.10.0
libtpu: 0.0.40
codegen_flags: <defaults>
</compile_context>

<pallas_src>
import functools

import jax
import jax.numpy as jnp
from jax import lax
from jax.experimental import pallas as pl
from jax.experimental.pallas import tpu as pltpu


def _attention_prop_kernel(head, head_dim,
                           x1_ref, x2_ref,
                           wq_ref, bq_ref, wkv_ref, bkv_ref,
                           wm_ref, bm_ref,
                           wc1a_ref, wc1b_ref, bc1_ref,
                           wc2_ref, bc2_ref,
                           out_ref, kv_ref):
    C = head * head_dim

    # ---- per-batch K/V projection, cached in VMEM scratch --------------------
    # Only the first query tile of each batch recomputes it; x2's block index is
    # constant within a batch, so Pallas does not re-DMA it across query tiles.
    @pl.when(pl.program_id(1) == 0)
    def _():
        kv_ref[...] = (jnp.dot(x2_ref[0], wkv_ref[...],
                               preferred_element_type=jnp.float32)
                       + bkv_ref[...])                       # (M, 2C) = [K | V]

    x1 = x1_ref[0]                                           # (tq, C) query-tile tokens

    # Q projection; 1/sqrt(head_dim) is already folded into wq/bq.
    q = jnp.dot(x1, wq_ref[...], preferred_element_type=jnp.float32) + bq_ref[...]

    # Contract over head_dim (last axis of both operands) -> no transposes.
    contract_hd = (((1,), (1,)), ((), ()))

    add_value = None
    for h in range(head):                                    # static unroll
        sl = slice(h * head_dim, (h + 1) * head_dim)
        qh = q[:, sl]                                        # (tq, hd)
        kh = kv_ref[:, sl]                                   # (M,  hd)
        vh = kv_ref[:, C + h * head_dim: C + (h + 1) * head_dim]   # (M, hd)

        # scores: einsum('nd,md->nm') (scale already folded into q)
        s = lax.dot_general(qh, kh, contract_hd,
                            preferred_element_type=jnp.float32)
        s = s - jnp.max(s, axis=-1, keepdims=True)           # stable softmax
        e = jnp.exp(s)
        denom = jnp.sum(e, axis=-1, keepdims=True)

        # Deferred normalization: unnormalized exp(s) @ V, then one (tq, hd)
        # rescale instead of a (tq, M) elementwise multiply.
        o_h = jnp.dot(e, vh, preferred_element_type=jnp.float32)
        o_h = o_h * pl.reciprocal(denom, approx=False)

        # mh_filter folded into the head loop: accumulate this head's full-width
        # (tq, C) contribution (no masked narrow-slice stores, no extra pass).
        contrib = jnp.dot(o_h, wm_ref[sl, :], preferred_element_type=jnp.float32)
        add_value = contrib if add_value is None else add_value + contrib
    add_value = add_value + bm_ref[...]

    # cat_filter: conv(2C->2C) + folded BN -> ReLU -> conv(2C->C), residual.
    # concat([x1, add_value]) @ Wc1^T  ==  x1 @ Wc1a + add_value @ Wc1b
    y = (jnp.dot(x1, wc1a_ref[...], preferred_element_type=jnp.float32)
         + jnp.dot(add_value, wc1b_ref[...], preferred_element_type=jnp.float32)
         + bc1_ref[...])
    y = jnp.maximum(y, 0.0)
    y2 = jnp.dot(y, wc2_ref[...], preferred_element_type=jnp.float32) + bc2_ref[...]

    out_ref[0] = x1 + y2


def _vmem_capacity_bytes():
    """Physical VMEM per TensorCore, with a conservative (v7x) fallback."""
    try:
        info = pltpu.get_tpu_info()
        cap = getattr(info, "vmem_capacity_bytes", None)
        if cap:
            return int(cap)
    except Exception:
        pass
    return 64 * 1024 * 1024


def _pick_q_tile(n, m, c, budget_bytes):
    """Largest query tile (dividing N) whose estimated VMEM footprint fits."""
    # Weights + biases (double-buffered by the pipeline).
    weight_bytes = 2 * 4 * (10 * c * c + 8 * c)
    # K/V scratch (single copy) + x2 block (double-buffered).
    fixed = weight_bytes + 4 * m * 2 * c + 2 * 4 * m * c

    def fits(t):
        per_tile = (2 * 2 * 4 * t * c        # x1 + out tiles, double-buffered
                    + 4 * t * c * 8          # q, add_value, y(2C), y2, slack
                    + 2 * 4 * t * m)         # s and e, live per head
        return fixed + per_tile <= budget_bytes

    candidates = [t for t in (2048, 1024, 512, 256, 128, 64, 32, 16, 8)
                  if t <= n and n % t == 0]
    for t in candidates:
        if fits(t):
            return t
    return candidates[-1] if candidates else n


def attention_propagation(motion1, motion2, params, head):
    B, C, N = motion1.shape
    _, C2, M = motion2.shape
    assert C2 == C
    assert C % head == 0, "channels must be divisible by head"
    head_dim = C // head
    inv_sqrt_d = 1.0 / float(head_dim) ** 0.5

    # ---- wrapper-side layout & folding (outside the kernel) -----------------
    # Token-major inputs: (B, N, C) so C sits on lanes inside the kernel.
    x1 = jnp.transpose(motion1, (0, 2, 1))
    x2 = jnp.transpose(motion2, (0, 2, 1))

    # Pre-transpose weights to (C_in, C_out); fold 1/sqrt(head_dim) into Wq/bq.
    wq_t = params["wq"].T * inv_sqrt_d
    bq_t = params["bq"].T * inv_sqrt_d
    # Fused K|V projection: one (C, 2C) matmul per batch.
    wkv_t = jnp.concatenate([params["wk"].T, params["wv"].T], axis=1)   # (C, 2C)
    bkv_t = jnp.concatenate([params["bk"].T, params["bv"].T], axis=1)   # (1, 2C)
    wm_t = params["wm"].T
    bm_t = params["bm"].T

    # Fold eval-mode BatchNorm into the first cat_filter conv.
    bn_scale = params["bn_scale"]                          # (2C, 1)
    wc1_eff = params["wc1"] * bn_scale                     # row (out-ch) scaled
    bc1_eff = params["bc1"] * bn_scale + params["bn_shift"]
    wc1a_t = wc1_eff[:, :C].T                              # (C, 2C) for x1
    wc1b_t = wc1_eff[:, C:].T                              # (C, 2C) for add_value
    bc1_t = bc1_eff.T                                      # (1, 2C)
    wc2_t = params["wc2"].T                                # (2C, C)
    bc2_t = params["bc2"].T                                # (1, C)

    # VMEM-budgeted query tile; vmem_limit follows the same per-chip capacity.
    vmem_cap = _vmem_capacity_bytes()
    budget = max(24 * 1024 * 1024, min(int(vmem_cap * 0.70), 96 * 1024 * 1024))
    vmem_limit = max(32 * 1024 * 1024,
                     min(int(vmem_cap * 0.85), 110 * 1024 * 1024))
    tq = _pick_q_tile(N, M, C, budget)
    n_qt = N // tq

    kernel = functools.partial(_attention_prop_kernel, head, head_dim)

    def const_spec(shape):
        # Weight / bias arrays: full block, same block at every grid step.
        return pl.BlockSpec(shape, lambda b, qi: (0,) * len(shape))

    in_specs = [
        pl.BlockSpec((1, tq, C), lambda b, qi: (b, qi, 0)),   # x1 (query tile)
        pl.BlockSpec((1, M, C), lambda b, qi: (b, 0, 0)),     # x2 (full K/V src)
        const_spec((C, C)), const_spec((1, C)),               # Wq' (scaled), bq'
        const_spec((C, 2 * C)), const_spec((1, 2 * C)),       # Wkv, bkv
        const_spec((C, C)), const_spec((1, C)),               # Wm, bm
        const_spec((C, 2 * C)), const_spec((C, 2 * C)),       # Wc1a, Wc1b
        const_spec((1, 2 * C)),                               # bc1 (BN folded)
        const_spec((2 * C, C)), const_spec((1, C)),           # Wc2, bc2
    ]

    out_t = pl.pallas_call(
        kernel,
        out_shape=jax.ShapeDtypeStruct((B, N, C), jnp.float32),
        grid_spec=pltpu.PrefetchScalarGridSpec(
            num_scalar_prefetch=0,
            grid=(B, n_qt),
            in_specs=in_specs,
            out_specs=pl.BlockSpec((1, tq, C), lambda b, qi: (b, qi, 0)),
            # Per-batch K|V cache: (M, 2C), persists across grid iterations.
            scratch_shapes=[pltpu.VMEM((M, 2 * C), jnp.float32)],
        ),
        compiler_params=pltpu.CompilerParams(
            # qi must be "arbitrary": the K/V cache is written at qi == 0 and
            # reused by later query tiles of the same batch.  B stays parallel
            # so v7x megacore still splits work when B > 1.
            dimension_semantics=("parallel", "arbitrary"),
            vmem_limit_bytes=vmem_limit),
    )(x1, x2,
      wq_t, bq_t, wkv_t, bkv_t, wm_t, bm_t,
      wc1a_t, wc1b_t, bc1_t, wc2_t, bc2_t)

    # Back to PyTorch's NCW layout.
    return jnp.transpose(out_t, (0, 2, 1))


def _reference(motion1, motion2, params, head):
    """Pure-JAX reference implementation for correctness checking."""
    B, C, N = motion1.shape
    head_dim = C // head

    def conv1x1(x, w, b):          # x: (B, Cin, N)
        return jnp.einsum('oc,bcn->bon', w, x) + b[None, :, :]

    q = conv1x1(motion1, params["wq"], params["bq"]).reshape(B, head, head_dim, -1)
    k = conv1x1(motion2, params["wk"], params["bk"]).reshape(B, head, head_dim, -1)
    v = conv1x1(motion2, params["wv"], params["bv"]).reshape(B, head, head_dim, -1)
    score = jax.nn.softmax(
        jnp.einsum('bhdn,bhdm->bhnm', q, k) / (head_dim ** 0.5), axis=-1)
    add_value = jnp.einsum('bhnm,bhdm->bhdn', score, v).reshape(B, C, -1)
    add_value = conv1x1(add_value, params["wm"], params["bm"])
    cat = jnp.concatenate([motion1, add_value], axis=1)
    y = conv1x1(cat, params["wc1"], params["bc1"])
    y = y * params["bn_scale"][None, :, :] + params["bn_shift"][None, :, :]
    y = jnp.maximum(y, 0.0)
    y2 = conv1x1(y, params["wc2"], params["bc2"])
    return motion1 + y2


def make_params(key, channels):
    C = channels
    ks = jax.random.split(key, 12)
    s = 0.1
    params = {
        "wq": jax.random.normal(ks[0], (C, C), jnp.float32) * s,
        "bq": jax.random.normal(ks[1], (C, 1), jnp.float32) * s,
        "wk": jax.random.normal(ks[2], (C, C), jnp.float32) * s,
        "bk": jax.random.normal(ks[3], (C, 1), jnp.float32) * s,
        "wv": jax.random.normal(ks[4], (C, C), jnp.float32) * s,
        "bv": jax.random.normal(ks[5], (C, 1), jnp.float32) * s,
        "wm": jax.random.normal(ks[6], (C, C), jnp.float32) * s,
        "bm": jax.random.normal(ks[7], (C, 1), jnp.float32) * s,
        "wc1": jax.random.normal(ks[8], (2 * C, 2 * C), jnp.float32) * s,
        "bc1": jax.random.normal(ks[9], (2 * C, 1), jnp.float32) * s,
        "wc2": jax.random.normal(ks[10], (C, 2 * C), jnp.float32) * s,
        "bc2": jax.random.normal(ks[11], (C, 1), jnp.float32) * s,
    }
    # BatchNorm1d (eval mode): gamma=1, beta=0, running_mean=0, running_var=1.
    eps = 1e-5
    gamma = jnp.ones((2 * C, 1), jnp.float32)
    beta = jnp.zeros((2 * C, 1), jnp.float32)
    mean = jnp.zeros((2 * C, 1), jnp.float32)
    var = jnp.ones((2 * C, 1), jnp.float32)
    scale = gamma / jnp.sqrt(var + eps)
    params["bn_scale"] = scale
    params["bn_shift"] = beta - mean * scale
    return params


if __name__ == "__main__":
    B, C, N, M, HEAD = 2, 32, 16, 16, 4

    key = jax.random.PRNGKey(0)
    k1, k2, k3 = jax.random.split(key, 3)
    motion1 = jax.random.normal(k1, (B, C, N), jnp.float32)
    motion2 = jax.random.normal(k2, (B, C, M), jnp.float32)
    params = make_params(k3, C)

    out = attention_propagation(motion1, motion2, params, HEAD)
    out = jax.block_until_ready(out)

    ref = _reference(motion1, motion2, params, HEAD)
    assert out.shape == (B, C, N)
    assert jnp.allclose(out, ref, atol=1e-4, rtol=1e-4), float(jnp.max(jnp.abs(out - ref)))

    print("KERNEL_OK")
</pallas_src>

<mosaic_0001>
module attributes {stable_mosaic.version = 11 : i64} {
  func.func @_attention_prop_kernel(%arg0: i32, %arg1: i32, %arg2: memref<1x16x32xf32, #tpu.memory_space<vmem>>, %arg3: memref<1x16x32xf32, #tpu.memory_space<vmem>>, %arg4: memref<32x32xf32, #tpu.memory_space<vmem>>, %arg5: memref<1x32xf32, #tpu.memory_space<vmem>>, %arg6: memref<32x64xf32, #tpu.memory_space<vmem>>, %arg7: memref<1x64xf32, #tpu.memory_space<vmem>>, %arg8: memref<32x32xf32, #tpu.memory_space<vmem>>, %arg9: memref<1x32xf32, #tpu.memory_space<vmem>>, %arg10: memref<32x64xf32, #tpu.memory_space<vmem>>, %arg11: memref<32x64xf32, #tpu.memory_space<vmem>>, %arg12: memref<1x64xf32, #tpu.memory_space<vmem>>, %arg13: memref<64x32xf32, #tpu.memory_space<vmem>>, %arg14: memref<1x32xf32, #tpu.memory_space<vmem>>, %arg15: memref<1x16x32xf32, #tpu.memory_space<vmem>>, %arg16: memref<16x64xf32, #tpu.memory_space<vmem>>) attributes {dimension_semantics = [#tpu.dimension_semantics<parallel>, #tpu.dimension_semantics<arbitrary>], iteration_bounds = array<i64: 2, 1>, scalar_prefetch = 0 : i64, scratch_operands = 1 : i64, tpu.core_type = #tpu.core_type<tc>, window_params = [{transform_indices = @transform_0, window_bounds = array<i64: 1, 16, 32>}, {transform_indices = @transform_1, window_bounds = array<i64: 1, 16, 32>}, {pipeline_mode = #tpu.pipeline_mode<synchronous>, transform_indices = @transform_2, window_bounds = array<i64: 32, 32>}, {pipeline_mode = #tpu.pipeline_mode<synchronous>, transform_indices = @transform_3, window_bounds = array<i64: 1, 32>}, {pipeline_mode = #tpu.pipeline_mode<synchronous>, transform_indices = @transform_4, window_bounds = array<i64: 32, 64>}, {pipeline_mode = #tpu.pipeline_mode<synchronous>, transform_indices = @transform_5, window_bounds = array<i64: 1, 64>}, {pipeline_mode = #tpu.pipeline_mode<synchronous>, transform_indices = @transform_6, window_bounds = array<i64: 32, 32>}, {pipeline_mode = #tpu.pipeline_mode<synchronous>, transform_indices = @transform_7, window_bounds = array<i64: 1, 32>}, {pipeline_mode = #tpu.pipeline_mode<synchronous>, transform_indices = @transform_8, window_bounds = array<i64: 32, 64>}, {pipeline_mode = #tpu.pipeline_mode<synchronous>, transform_indices = @transform_9, window_bounds = array<i64: 32, 64>}, {pipeline_mode = #tpu.pipeline_mode<synchronous>, transform_indices = @transform_10, window_bounds = array<i64: 1, 64>}, {pipeline_mode = #tpu.pipeline_mode<synchronous>, transform_indices = @transform_11, window_bounds = array<i64: 64, 32>}, {pipeline_mode = #tpu.pipeline_mode<synchronous>, transform_indices = @transform_12, window_bounds = array<i64: 1, 32>}, {transform_indices = @transform_13, window_bounds = array<i64: 1, 16, 32>}]} {
    %c0_i32 = arith.constant 0 : i32
    %0 = arith.cmpi eq, %arg1, %c0_i32 : i32
    %1 = arith.extui %0 : i1 to i32
    %c0_i32_0 = arith.constant 0 : i32
    %2 = arith.cmpi ne, %1, %c0_i32_0 : i32
    scf.if %2 {
      %c0_63 = arith.constant 0 : index
      %c0_64 = arith.constant 0 : index
      %c0_65 = arith.constant 0 : index
      %103 = vector.load %arg3[%c0_63, %c0_64, %c0_65] : memref<1x16x32xf32, #tpu.memory_space<vmem>>, vector<1x16x32xf32>
      %104 = vector.shape_cast %103 : vector<1x16x32xf32> to vector<16x32xf32>
      %c0_66 = arith.constant 0 : index
      %c0_67 = arith.constant 0 : index
      %105 = vector.load %arg6[%c0_66, %c0_67] : memref<32x64xf32, #tpu.memory_space<vmem>>, vector<32x64xf32>
      %cst_68 = arith.constant dense<0.000000e+00> : vector<16x64xf32>
      %106 = tpu.matmul %104, %105, %cst_68 {dimension_numbers = #tpu.dot_dimension_numbers<[1], [0], [0], [1], [0, 0, 1, 1], [], []>} : vector<16x32xf32>, vector<32x64xf32>, vector<16x64xf32> -> vector<16x64xf32>
      %c0_69 = arith.constant 0 : index
      %c0_70 = arith.constant 0 : index
      %107 = vector.load %arg7[%c0_69, %c0_70] : memref<1x64xf32, #tpu.memory_space<vmem>>, vector<1x64xf32>
      %108 = vector.broadcast %107 : vector<1x64xf32> to vector<16x64xf32>
      %109 = arith.addf %106, %108 : vector<16x64xf32>
      %c0_71 = arith.constant 0 : index
      %c0_72 = arith.constant 0 : index
      %110 = vector.load %arg16[%c0_71, %c0_72] : memref<16x64xf32, #tpu.memory_space<vmem>>, vector<16x64xf32>
      tpu.vector_store %arg16[%c0_71, %c0_72], %109 {strides = array<i32>} : memref<16x64xf32, #tpu.memory_space<vmem>>, vector<16x64xf32>,
    } else {
    }
    %c0 = arith.constant 0 : index
    %c0_1 = arith.constant 0 : index
    %c0_2 = arith.constant 0 : index
    %3 = vector.load %arg2[%c0, %c0_1, %c0_2] : memref<1x16x32xf32, #tpu.memory_space<vmem>>, vector<1x16x32xf32>
    %4 = vector.shape_cast %3 : vector<1x16x32xf32> to vector<16x32xf32>
    %c0_3 = arith.constant 0 : index
    %c0_4 = arith.constant 0 : index
    %5 = vector.load %arg4[%c0_3, %c0_4] : memref<32x32xf32, #tpu.memory_space<vmem>>, vector<32x32xf32>
    %cst = arith.constant dense<0.000000e+00> : vector<16x32xf32>
    %6 = tpu.matmul %4, %5, %cst {dimension_numbers = #tpu.dot_dimension_numbers<[1], [0], [0], [1], [0, 0, 1, 1], [], []>} : vector<16x32xf32>, vector<32x32xf32>, vector<16x32xf32> -> vector<16x32xf32>
    %c0_5 = arith.constant 0 : index
    %c0_6 = arith.constant 0 : index
    %7 = vector.load %arg5[%c0_5, %c0_6] : memref<1x32xf32, #tpu.memory_space<vmem>>, vector<1x32xf32>
    %8 = vector.broadcast %7 : vector<1x32xf32> to vector<16x32xf32>
    %9 = arith.addf %6, %8 : vector<16x32xf32>
    %10 = vector.extract_strided_slice %9 {offsets = [0, 0], sizes = [16, 8], strides = [1, 1]} : vector<16x32xf32> to vector<16x8xf32>
    %c0_7 = arith.constant 0 : index
    %c0_8 = arith.constant 0 : index
    %11 = vector.load %arg16[%c0_7, %c0_8] : memref<16x64xf32, #tpu.memory_space<vmem>>, vector<16x8xf32>
    %c0_9 = arith.constant 0 : index
    %c32 = arith.constant 32 : index
    %12 = vector.load %arg16[%c0_9, %c32] : memref<16x64xf32, #tpu.memory_space<vmem>>, vector<16x8xf32>
    %cst_10 = arith.constant dense<0.000000e+00> : vector<16x16xf32>
    %13 = tpu.matmul %10, %11, %cst_10 {dimension_numbers = #tpu.dot_dimension_numbers<[1], [1], [0], [0], [0, 0, 1, 0], [], []>} : vector<16x8xf32>, vector<16x8xf32>, vector<16x16xf32> -> vector<16x16xf32>
    %cst_11 = arith.constant dense<0xFF800000> : vector<16xf32>
    %14 = vector.multi_reduction <maximumf>, %13, %cst_11 [1] : vector<16x16xf32> to vector<16xf32>
    %15 = vector.shape_cast %14 : vector<16xf32> to vector<16x1xf32>
    %16 = vector.broadcast %15 : vector<16x1xf32> to vector<16x16xf32>
    %17 = arith.subf %13, %16 : vector<16x16xf32>
    %18 = math.exp %17 : vector<16x16xf32>
    %cst_12 = arith.constant dense<0.000000e+00> : vector<16xf32>
    %19 = vector.multi_reduction <add>, %18, %cst_12 [1] : vector<16x16xf32> to vector<16xf32>
    %20 = vector.shape_cast %19 : vector<16xf32> to vector<16x1xf32>
    %cst_13 = arith.constant dense<0.000000e+00> : vector<16x8xf32>
    %21 = tpu.matmul %18, %12, %cst_13 {dimension_numbers = #tpu.dot_dimension_numbers<[1], [0], [0], [1], [0, 0, 1, 1], [], []>} : vector<16x16xf32>, vector<16x8xf32>, vector<16x8xf32> -> vector<16x8xf32>
    %22 = tpu.reciprocal %20 : vector<16x1xf32> -> vector<16x1xf32>
    %23 = vector.broadcast %22 : vector<16x1xf32> to vector<16x8xf32>
    %24 = arith.mulf %21, %23 : vector<16x8xf32>
    %c0_14 = arith.constant 0 : index
    %c0_15 = arith.constant 0 : index
    %25 = vector.load %arg8[%c0_14, %c0_15] : memref<32x32xf32, #tpu.memory_space<vmem>>, vector<8x32xf32>
    %cst_16 = arith.constant dense<0.000000e+00> : vector<16x32xf32>
    %26 = tpu.matmul %24, %25, %cst_16 {dimension_numbers = #tpu.dot_dimension_numbers<[1], [0], [0], [1], [0, 0, 1, 1], [], []>} : vector<16x8xf32>, vector<8x32xf32>, vector<16x32xf32> -> vector<16x32xf32>
    %27 = vector.extract_strided_slice %9 {offsets = [0, 8], sizes = [16, 8], strides = [1, 1]} : vector<16x32xf32> to vector<16x8xf32>
    %c0_17 = arith.constant 0 : index
    %c8 = arith.constant 8 : index
    %28 = vector.load %arg16[%c0_17, %c8] : memref<16x64xf32, #tpu.memory_space<vmem>>, vector<16x8xf32>
    %c0_18 = arith.constant 0 : index
    %c40 = arith.constant 40 : index
    %29 = vector.load %arg16[%c0_18, %c40] : memref<16x64xf32, #tpu.memory_space<vmem>>, vector<16x8xf32>
    %cst_19 = arith.constant dense<0.000000e+00> : vector<16x16xf32>
    %30 = tpu.matmul %27, %28, %cst_19 {dimension_numbers = #tpu.dot_dimension_numbers<[1], [1], [0], [0], [0, 0, 1, 0], [], []>} : vector<16x8xf32>, vector<16x8xf32>, vector<16x16xf32> -> vector<16x16xf32>
    %cst_20 = arith.constant dense<0xFF800000> : vector<16xf32>
    %31 = vector.multi_reduction <maximumf>, %30, %cst_20 [1] : vector<16x16xf32> to vector<16xf32>
    %32 = vector.shape_cast %31 : vector<16xf32> to vector<16x1xf32>
    %33 = vector.broadcast %32 : vector<16x1xf32> to vector<16x16xf32>
    %34 = arith.subf %30, %33 : vector<16x16xf32>
    %35 = math.exp %34 : vector<16x16xf32>
    %cst_21 = arith.constant dense<0.000000e+00> : vector<16xf32>
    %36 = vector.multi_reduction <add>, %35, %cst_21 [1] : vector<16x16xf32> to vector<16xf32>
    %37 = vector.shape_cast %36 : vector<16xf32> to vector<16x1xf32>
    %cst_22 = arith.constant dense<0.000000e+00> : vector<16x8xf32>
    %38 = tpu.matmul %35, %29, %cst_22 {dimension_numbers = #tpu.dot_dimension_numbers<[1], [0], [0], [1], [0, 0, 1, 1], [], []>} : vector<16x16xf32>, vector<16x8xf32>, vector<16x8xf32> -> vector<16x8xf32>
    %39 = tpu.reciprocal %37 : vector<16x1xf32> -> vector<16x1xf32>
    %40 = vector.broadcast %39 : vector<16x1xf32> to vector<16x8xf32>
    %41 = arith.mulf %38, %40 : vector<16x8xf32>
    %c8_23 = arith.constant 8 : index
    %c0_24 = arith.constant 0 : index
    %42 = vector.load %arg8[%c8_23, %c0_24] : memref<32x32xf32, #tpu.memory_space<vmem>>, vector<8x32xf32>
    %cst_25 = arith.constant dense<0.000000e+00> : vector<16x32xf32>
    %43 = tpu.matmul %41, %42, %cst_25 {dimension_numbers = #tpu.dot_dimension_numbers<[1], [0], [0], [1], [0, 0, 1, 1], [], []>} : vector<16x8xf32>, vector<8x32xf32>, vector<16x32xf32> -> vector<16x32xf32>
    %44 = arith.addf %26, %43 : vector<16x32xf32>
    %45 = vector.extract_strided_slice %9 {offsets = [0, 16], sizes = [16, 8], strides = [1, 1]} : vector<16x32xf32> to vector<16x8xf32>
    %c0_26 = arith.constant 0 : index
    %c16 = arith.constant 16 : index
    %46 = vector.load %arg16[%c0_26, %c16] : memref<16x64xf32, #tpu.memory_space<vmem>>, vector<16x8xf32>
    %c0_27 = arith.constant 0 : index
    %c48 = arith.constant 48 : index
    %47 = vector.load %arg16[%c0_27, %c48] : memref<16x64xf32, #tpu.memory_space<vmem>>, vector<16x8xf32>
    %cst_28 = arith.constant dense<0.000000e+00> : vector<16x16xf32>
    %48 = tpu.matmul %45, %46, %cst_28 {dimension_numbers = #tpu.dot_dimension_numbers<[1], [1], [0], [0], [0, 0, 1, 0], [], []>} : vector<16x8xf32>, vector<16x8xf32>, vector<16x16xf32> -> vector<16x16xf32>
    %cst_29 = arith.constant dense<0xFF800000> : vector<16xf32>
    %49 = vector.multi_reduction <maximumf>, %48, %cst_29 [1] : vector<16x16xf32> to vector<16xf32>
    %50 = vector.shape_cast %49 : vector<16xf32> to vector<16x1xf32>
    %51 = vector.broadcast %50 : vector<16x1xf32> to vector<16x16xf32>
    %52 = arith.subf %48, %51 : vector<16x16xf32>
    %53 = math.exp %52 : vector<16x16xf32>
    %cst_30 = arith.constant dense<0.000000e+00> : vector<16xf32>
    %54 = vector.multi_reduction <add>, %53, %cst_30 [1] : vector<16x16xf32> to vector<16xf32>
    %55 = vector.shape_cast %54 : vector<16xf32> to vector<16x1xf32>
    %cst_31 = arith.constant dense<0.000000e+00> : vector<16x8xf32>
    %56 = tpu.matmul %53, %47, %cst_31 {dimension_numbers = #tpu.dot_dimension_numbers<[1], [0], [0], [1], [0, 0, 1, 1], [], []>} : vector<16x16xf32>, vector<16x8xf32>, vector<16x8xf32> -> vector<16x8xf32>
    %57 = tpu.reciprocal %55 : vector<16x1xf32> -> vector<16x1xf32>
    %58 = vector.broadcast %57 : vector<16x1xf32> to vector<16x8xf32>
    %59 = arith.mulf %56, %58 : vector<16x8xf32>
    %c16_32 = arith.constant 16 : index
    %c0_33 = arith.constant 0 : index
    %60 = vector.load %arg8[%c16_32, %c0_33] : memref<32x32xf32, #tpu.memory_space<vmem>>, vector<8x32xf32>
    %cst_34 = arith.constant dense<0.000000e+00> : vector<16x32xf32>
    %61 = tpu.matmul %59, %60, %cst_34 {dimension_numbers = #tpu.dot_dimension_numbers<[1], [0], [0], [1], [0, 0, 1, 1], [], []>} : vector<16x8xf32>, vector<8x32xf32>, vector<16x32xf32> -> vector<16x32xf32>
    %62 = arith.addf %44, %61 : vector<16x32xf32>
    %63 = vector.extract_strided_slice %9 {offsets = [0, 24], sizes = [16, 8], strides = [1, 1]} : vector<16x32xf32> to vector<16x8xf32>
    %c0_35 = arith.constant 0 : index
    %c24 = arith.constant 24 : index
    %64 = vector.load %arg16[%c0_35, %c24] : memref<16x64xf32, #tpu.memory_space<vmem>>, vector<16x8xf32>
    %c0_36 = arith.constant 0 : index
    %c56 = arith.constant 56 : index
    %65 = vector.load %arg16[%c0_36, %c56] : memref<16x64xf32, #tpu.memory_space<vmem>>, vector<16x8xf32>
    %cst_37 = arith.constant dense<0.000000e+00> : vector<16x16xf32>
    %66 = tpu.matmul %63, %64, %cst_37 {dimension_numbers = #tpu.dot_dimension_numbers<[1], [1], [0], [0], [0, 0, 1, 0], [], []>} : vector<16x8xf32>, vector<16x8xf32>, vector<16x16xf32> -> vector<16x16xf32>
    %cst_38 = arith.constant dense<0xFF800000> : vector<16xf32>
    %67 = vector.multi_reduction <maximumf>, %66, %cst_38 [1] : vector<16x16xf32> to vector<16xf32>
    %68 = vector.shape_cast %67 : vector<16xf32> to vector<16x1xf32>
    %69 = vector.broadcast %68 : vector<16x1xf32> to vector<16x16xf32>
    %70 = arith.subf %66, %69 : vector<16x16xf32>
    %71 = math.exp %70 : vector<16x16xf32>
    %cst_39 = arith.constant dense<0.000000e+00> : vector<16xf32>
    %72 = vector.multi_reduction <add>, %71, %cst_39 [1] : vector<16x16xf32> to vector<16xf32>
    %73 = vector.shape_cast %72 : vector<16xf32> to vector<16x1xf32>
    %cst_40 = arith.constant dense<0.000000e+00> : vector<16x8xf32>
    %74 = tpu.matmul %71, %65, %cst_40 {dimension_numbers = #tpu.dot_dimension_numbers<[1], [0], [0], [1], [0, 0, 1, 1], [], []>} : vector<16x16xf32>, vector<16x8xf32>, vector<16x8xf32> -> vector<16x8xf32>
    %75 = tpu.reciprocal %73 : vector<16x1xf32> -> vector<16x1xf32>
    %76 = vector.broadcast %75 : vector<16x1xf32> to vector<16x8xf32>
    %77 = arith.mulf %74, %76 : vector<16x8xf32>
    %c24_41 = arith.constant 24 : index
    %c0_42 = arith.constant 0 : index
    %78 = vector.load %arg8[%c24_41, %c0_42] : memref<32x32xf32, #tpu.memory_space<vmem>>, vector<8x32xf32>
    %cst_43 = arith.constant dense<0.000000e+00> : vector<16x32xf32>
    %79 = tpu.matmul %77, %78, %cst_43 {dimension_numbers = #tpu.dot_dimension_numbers<[1], [0], [0], [1], [0, 0, 1, 1], [], []>} : vector<16x8xf32>, vector<8x32xf32>, vector<16x32xf32> -> vector<16x32xf32>
    %80 = arith.addf %62, %79 : vector<16x32xf32>
    %c0_44 = arith.constant 0 : index
    %c0_45 = arith.constant 0 : index
    %81 = vector.load %arg9[%c0_44, %c0_45] : memref<1x32xf32, #tpu.memory_space<vmem>>, vector<1x32xf32>
    %82 = vector.broadcast %81 : vector<1x32xf32> to vector<16x32xf32>
    %83 = arith.addf %80, %82 : vector<16x32xf32>
    %c0_46 = arith.constant 0 : index
    %c0_47 = arith.constant 0 : index
    %84 = vector.load %arg10[%c0_46, %c0_47] : memref<32x64xf32, #tpu.memory_space<vmem>>, vector<32x64xf32>
    %cst_48 = arith.constant dense<0.000000e+00> : vector<16x64xf32>
    %85 = tpu.matmul %4, %84, %cst_48 {dimension_numbers = #tpu.dot_dimension_numbers<[1], [0], [0], [1], [0, 0, 1, 1], [], []>} : vector<16x32xf32>, vector<32x64xf32>, vector<16x64xf32> -> vector<16x64xf32>
    %c0_49 = arith.constant 0 : index
    %c0_50 = arith.constant 0 : index
    %86 = vector.load %arg11[%c0_49, %c0_50] : memref<32x64xf32, #tpu.memory_space<vmem>>, vector<32x64xf32>
    %cst_51 = arith.constant dense<0.000000e+00> : vector<16x64xf32>
    %87 = tpu.matmul %83, %86, %cst_51 {dimension_numbers = #tpu.dot_dimension_numbers<[1], [0], [0], [1], [0, 0, 1, 1], [], []>} : vector<16x32xf32>, vector<32x64xf32>, vector<16x64xf32> -> vector<16x64xf32>
    %88 = arith.addf %85, %87 : vector<16x64xf32>
    %c0_52 = arith.constant 0 : index
    %c0_53 = arith.constant 0 : index
    %89 = vector.load %arg12[%c0_52, %c0_53] : memref<1x64xf32, #tpu.memory_space<vmem>>, vector<1x64xf32>
    %90 = vector.broadcast %89 : vector<1x64xf32> to vector<16x64xf32>
    %91 = arith.addf %88, %90 : vector<16x64xf32>
    %cst_54 = arith.constant 0.000000e+00 : f32
    %92 = vector.broadcast %cst_54 : f32 to vector<16x64xf32>
    %93 = arith.maximumf %91, %92 : vector<16x64xf32>
    %c0_55 = arith.constant 0 : index
    %c0_56 = arith.constant 0 : index
    %94 = vector.load %arg13[%c0_55, %c0_56] : memref<64x32xf32, #tpu.memory_space<vmem>>, vector<64x32xf32>
    %cst_57 = arith.constant dense<0.000000e+00> : vector<16x32xf32>
    %95 = tpu.matmul %93, %94, %cst_57 {dimension_numbers = #tpu.dot_dimension_numbers<[1], [0], [0], [1], [0, 0, 1, 1], [], []>} : vector<16x64xf32>, vector<64x32xf32>, vector<16x32xf32> -> vector<16x32xf32>
    %c0_58 = arith.constant 0 : index
    %c0_59 = arith.constant 0 : index
    %96 = vector.load %arg14[%c0_58, %c0_59] : memref<1x32xf32, #tpu.memory_space<vmem>>, vector<1x32xf32>
    %97 = vector.broadcast %96 : vector<1x32xf32> to vector<16x32xf32>
    %98 = arith.addf %95, %97 : vector<16x32xf32>
    %99 = arith.addf %4, %98 : vector<16x32xf32>
    %c0_60 = arith.constant 0 : index
    %c0_61 = arith.constant 0 : index
    %c0_62 = arith.constant 0 : index
    %100 = vector.load %arg15[%c0_60, %c0_61, %c0_62] : memref<1x16x32xf32, #tpu.memory_space<vmem>>, vector<1x16x32xf32>
    %101 = vector.shape_cast %100 : vector<1x16x32xf32> to vector<16x32xf32>
    %102 = vector.shape_cast %99 : vector<16x32xf32> to vector<1x16x32xf32>
    tpu.vector_store %arg15[%c0_60, %c0_61, %c0_62], %102 {strides = array<i32>} : memref<1x16x32xf32, #tpu.memory_space<vmem>>, vector<1x16x32xf32>,
    return
  }
  func.func @transform_0(%arg0: i32, %arg1: i32) -> (i32, i32, i32) {
    %c0_i32 = arith.constant 0 : i32
    %c0_i32_0 = arith.constant 0 : i32
    return %arg0, %arg1, %c0_i32 : i32, i32, i32
  }
  func.func @transform_1(%arg0: i32, %arg1: i32) -> (i32, i32, i32) {
    %c0_i32 = arith.constant 0 : i32
    %c0_i32_0 = arith.constant 0 : i32
    %c0_i32_1 = arith.constant 0 : i32
    return %arg0, %c0_i32, %c0_i32_0 : i32, i32, i32
  }
  func.func @transform_2(%arg0: i32, %arg1: i32) -> (i32, i32) {
    %c0_i32 = arith.constant 0 : i32
    %c0_i32_0 = arith.constant 0 : i32
    %c0_i32_1 = arith.constant 0 : i32
    return %c0_i32, %c0_i32_0 : i32, i32
  }
  func.func @transform_3(%arg0: i32, %arg1: i32) -> (i32, i32) {
    %c0_i32 = arith.constant 0 : i32
    %c0_i32_0 = arith.constant 0 : i32
    %c0_i32_1 = arith.constant 0 : i32
    return %c0_i32, %c0_i32_0 : i32, i32
  }
  func.func @transform_4(%arg0: i32, %arg1: i32) -> (i32, i32) {
    %c0_i32 = arith.constant 0 : i32
    %c0_i32_0 = arith.constant 0 : i32
    %c0_i32_1 = arith.constant 0 : i32
    return %c0_i32, %c0_i32_0 : i32, i32
  }
  func.func @transform_5(%arg0: i32, %arg1: i32) -> (i32, i32) {
    %c0_i32 = arith.constant 0 : i32
    %c0_i32_0 = arith.constant 0 : i32
    %c0_i32_1 = arith.constant 0 : i32
    return %c0_i32, %c0_i32_0 : i32, i32
  }
  func.func @transform_6(%arg0: i32, %arg1: i32) -> (i32, i32) {
    %c0_i32 = arith.constant 0 : i32
    %c0_i32_0 = arith.constant 0 : i32
    %c0_i32_1 = arith.constant 0 : i32
    return %c0_i32, %c0_i32_0 : i32, i32
  }
  func.func @transform_7(%arg0: i32, %arg1: i32) -> (i32, i32) {
    %c0_i32 = arith.constant 0 : i32
    %c0_i32_0 = arith.constant 0 : i32
    %c0_i32_1 = arith.constant 0 : i32
    return %c0_i32, %c0_i32_0 : i32, i32
  }
  func.func @transform_8(%arg0: i32, %arg1: i32) -> (i32, i32) {
    %c0_i32 = arith.constant 0 : i32
    %c0_i32_0 = arith.constant 0 : i32
    %c0_i32_1 = arith.constant 0 : i32
    return %c0_i32, %c0_i32_0 : i32, i32
  }
  func.func @transform_9(%arg0: i32, %arg1: i32) -> (i32, i32) {
    %c0_i32 = arith.constant 0 : i32
    %c0_i32_0 = arith.constant 0 : i32
    %c0_i32_1 = arith.constant 0 : i32
    return %c0_i32, %c0_i32_0 : i32, i32
  }
  func.func @transform_10(%arg0: i32, %arg1: i32) -> (i32, i32) {
    %c0_i32 = arith.constant 0 : i32
    %c0_i32_0 = arith.constant 0 : i32
    %c0_i32_1 = arith.constant 0 : i32
    return %c0_i32, %c0_i32_0 : i32, i32
  }
  func.func @transform_11(%arg0: i32, %arg1: i32) -> (i32, i32) {
    %c0_i32 = arith.constant 0 : i32
    %c0_i32_0 = arith.constant 0 : i32
    %c0_i32_1 = arith.constant 0 : i32
    return %c0_i32, %c0_i32_0 : i32, i32
  }
  func.func @transform_12(%arg0: i32, %arg1: i32) -> (i32, i32) {
    %c0_i32 = arith.constant 0 : i32
    %c0_i32_0 = arith.constant 0 : i32
    %c0_i32_1 = arith.constant 0 : i32
    return %c0_i32, %c0_i32_0 : i32, i32
  }
  func.func @transform_13(%arg0: i32, %arg1: i32) -> (i32, i32, i32) {
    %c0_i32 = arith.constant 0 : i32
    %c0_i32_0 = arith.constant 0 : i32
    return %arg0, %arg1, %c0_i32 : i32, i32, i32
  }
}

</mosaic_0001>

<bundles_post_ra>
// kernel: tpu_custom_call.1
= control target key start
LH: loop header
LB: loop body
LE: loop exit
PB: predicated region body
PF: predicated region fallthrough
CT: control target
= control target key end

     0   :  { %s3557_s0 = inlined_call_operand.vmem [shape: f32[2,16,32], index: 0, kind: input, shape index: {}]   ;;  %s3558_s1 = inlined_call_operand.vmem [shape: f32[2,16,32], index: 1, kind: input, shape index: {}]   ;;  %s3559_s2 = inlined_call_operand.vmem [shape: f32[32,32], index: 2, kind: input, shape index: {}]   ;;  %s3560_s3 = inlined_call_operand.vmem [shape: f32[1,32], index: 3, kind: input, shape index: {}]   ;;  %s3561_s4 = inlined_call_operand.hbm [shape: f32[32,64], index: 4, kind: input, shape index: {}]   ;;  %s3562_s5 = inlined_call_operand.vmem [shape: f32[1,64], index: 5, kind: input, shape index: {}]   ;;  %s3563_s6 = inlined_call_operand.hbm [shape: f32[32,32], index: 6, kind: input, shape index: {}]   ;;  %s3564_s7 = inlined_call_operand.vmem [shape: f32[1,32], index: 7, kind: input, shape index: {}]   ;;  %s3565_s8 = inlined_call_operand.hbm [shape: f32[32,64], index: 8, kind: input, shape index: {}]   ;;  %s3566_s9 = inlined_call_operand.hbm [shape: f32[32,64], index: 9, kind: input, shape index: {}]   ;;  %s3567_s10 = inlined_call_operand.vmem [shape: f32[1,64], index: 10, kind: input, shape index: {}]   ;;  %s3568_s11 = inlined_call_operand.vmem [shape: f32[64,32], index: 11, kind: input, shape index: {}]   ;;  %s3569_s12 = inlined_call_operand.vmem [shape: f32[1,32], index: 12, kind: input, shape index: {}]   ;;  %s3570_s13 = inlined_call_operand.hbm [shape: f32[2,16,32], index: 13, kind: output, shape index: {}]  }
   0x1   :  { %3585 = sst [smem:[#allocation24_spill]] %s3563_s6 }
   0x2   :  { %3586 = sst [smem:[#allocation25_spill]] %s3567_s10 }
   0x3   :  { %3587 = sst [smem:[#allocation26_spill]] %s3569_s12 }
   0x4   :  { %3588 = sst [smem:[#allocation27_spill]] %s3570_s13 }
   0x5   :  { %18 = vsyncpa [#allocation4], 0 }
   0x6   :  { %19 = vsyncpa [#allocation7], 0 }
   0x7   :  { %20 = vsyncpa [#allocation10], 0 }
   0x8   :  { %21 = vsyncpa [#allocation5], 0 }
   0x9   :  { %23 = vsyncpa [#allocation5 + $0x1], 0  ;;  %s3161_s25 = smov 0   ;;  %s3163_s26 = smov 0  }
   0xa   :  { %s3165_s27 = smov 0   ;;  %s3167_s28 = smov 0  }
   0xb   :  { %s3169_s29 = smov 0   ;;  %s3171_s30 = smov 0  }
   0xc LB: > { %3589 = sst [smem:[#allocation16_spill]] %s3053_s25  ;;  %s2311_s14 = sadd.s32 4294967295, %s3073_s30   ;;  %s3073_s30 = sphi %s3171_s30, %s29_s30   ;;  %s3069_s29 = sphi %s3169_s29, %s3620_s29   ;;  %s3065_s28 = sphi %s3167_s28, %s3619_s28   ;;  %s3061_s27 = sphi %s3165_s27, %s3618_s27   ;;  %s3057_s26 = sphi %s3163_s26, %s3622_s26   ;;  %s3053_s25 = sphi %s3161_s25, %s3621_s25  }
   0xd   : > { %3590 = sst [smem:[#allocation17_spill]] %s3061_s27  ;;  %s2312_s15 = sadd.s32 4294967294, %s3073_s30  }
   0xe   : > { %3591 = sst [smem:[#allocation18_spill]] %s3069_s29  ;;  %s41_s16 = sadd.s32 1, %s3069_s29 }
   0xf   : > { %3592 = sst [smem:[#allocation19_spill]] %s3073_s30  ;;  %s335_s17 = sadd.s32 1, %s3061_s27 }
  0x10   : > { %p43_p0 = scmp.ge.s32.totalorder %s41_s16, 2  ;;  %p345_p1 = scmp.ne.s32.totalorder %s3061_s27, %s3057_s26 }
  0x11   : > { %p346_p2 = scmp.eq.s32.totalorder %s2311_s14, 1  ;;  %p351_p3 = scmp.ne.s32.totalorder %s3057_s26, %s3053_s25 }
  0x12   : > { %s3624_s16 = smov (%p43_p0, %s41_s16), 0  ;;  %p352_p5 = scmp.eq.s32.totalorder %s2312_s15, 1 }
  0x13   : > { %3593 = sst [smem:[#allocation20_spill]] %s3624_s16  ;;  %p3201_p4 = por %p346_p2, %p345_p1 }
  0x14   : > { %s330_s19 = ssub.s32 %s3069_s29, %s3624_s16  ;;  %p2313_p6 = scmp.ge.s32.totalorder %s3073_s30, 1 }
  0x15   : > { %s3594_s18 = scalar_select %p3201_p4, 1, 0 }
  0x16   : > { %p333_p7 = scmp.eq.s32.totalorder %s330_s19, 0  ;;  %p3208_p8 = por %p352_p5, %p351_p3 }
  0x17   : > { %3595 = sst [smem:[#allocation21_spill]] %s3594_s18  ;;  %p359_p9 = scmp.lt.s32.totalorder %s3073_s30, 3 }
  0x18   : > { %s3596_s20 = scalar_select %p3208_p8, 1, 0 }
  0x19   : > { %s3214_s21 = scalar_select %p333_p7, %s3061_s27, %s335_s17  }
  0x1a   : > { %3597 = sst [smem:[#allocation22_spill]] %s3596_s20  ;;  %p3216_p10 = pnand %p2313_p6, %p359_p9 }
  0x1b   : > { %3598 = sst [smem:[#allocation23_spill]] %s3214_s21  ;;  %p3220_p11 = scmp.eq.s32.totalorder %s2311_s14, 0 }
  0x1c   : > { %s3599_s22 = scalar_select %p3216_p10, 1, 0 }
  0x1d   : > { %s3600_s23 = scalar_select %p3220_p11, 1, 0 }
  0x1e   : > { %p2715_p12 = pneg %p3216_p10  ;;  %s3075_s24 = smov [#allocation6]  }
  0x1f   : > { %s393_s15 = sshll.u32 %s3075_s24, 4  ;;  %s3076_s17 = smov [#allocation3]   ;;  %s394_s15 = int_to_ptr.vmem [resolvable:$true] %s393_s15 }
  0x20   : > { %p3228_p13 = pnand %p3220_p11, %p2715_p12  ;;  %s377_s16 = sshll.u32 %s3076_s17, 4  ;;  %s378_s16 = int_to_ptr.vmem [resolvable:$true] %s377_s16 }
  0x21   : > { %s3602_s6 = sld [smem:[#allocation24_spill]] }
  0x22   : > { %p3240_p1 = pneg %p3228_p13 }
  0x27   : > { %s2871_s14 = scalar_lea.hbm %s3602_s6, 512 }
  0x28   : > { %p2872_p0 = scmp.ne.s32.totalorder %s3602_s6, %s2871_s14  ;;  %p2878_p5 = scmp.lt.u32.totalorder %s2871_s14, %s3602_s6 }
  0x2a   : > { %p2874_p2 = pnand %p3240_p1, %p2872_p0 }
  0x2c   : > { %p2875_p3 = pneg %p2874_p2 }
  0x2e   : > { %p2880_p6 = pnand %p2878_p5, %p2875_p3 }
  0x30   : > { %2883 = shalt.err (!%p2880_p6)
}
  0x31   : > { %s2884_s29 = scalar_lea.vmem %s394_s15, 512  ;;  %p2892_p8 = scmp.lt.s32.totalorder %s394_s15, %s394_s15 }
  0x32   : > { %p2885_p7 = scmp.ne.s32.totalorder %s394_s15, %s2884_s29  ;;  %p2893_p4 = scmp.lt.s32.totalorder %s2884_s29, %s2884_s29 }
  0x34   : > { %p2887_p9 = pnand %p2885_p7, %p3240_p1  ;;  %p2894_p11 = por %p2893_p4, %p2892_p8 }
  0x36   : > { %p2888_p12 = pneg %p2887_p9 }
  0x38   : > { %p2895_p10 = pnand %p2894_p11, %p2888_p12 }
  0x3a   : > { %2898 = shalt.err (!%p2895_p10)
}
  0x3b   : > { %s3077_s27 = smov 128   ;;  %s3078_s20 = smov 8  }
  0x3c   : > { %2721 = dma.hbm_to_vmem [thread:$0]  (!%p3228_p13), %s3602_s6, 512, %s394_s15, [#allocation7], %s3077_s27, %s3077_s27, %s3078_s20  }
  0x3d   : > { %s2899_s14 = scalar_lea.hbm %s3561_s4, 512 }
  0x3e   : > { %p2900_p4 = scmp.ne.s32.totalorder %s3561_s4, %s2899_s14  ;;  %p2906_p11 = scmp.lt.u32.totalorder %s2899_s14, %s3561_s4 }
  0x40   : > { %p2902_p8 = pnand %p2900_p4, %p3240_p1 }
  0x42   : > { %p2903_p10 = pneg %p2902_p8 }
  0x44   : > { %p2908_p0 = pnand %p2906_p11, %p2903_p10 }
  0x46   : > { %2911 = shalt.err (!%p2908_p0)
}
  0x47   : > { %s2912_s25 = scalar_lea.vmem %s378_s16, 512  ;;  %p2920_p6 = scmp.lt.s32.totalorder %s378_s16, %s378_s16 }
  0x48   : > { %p2913_p2 = scmp.ne.s32.totalorder %s378_s16, %s2912_s25  ;;  %p2921_p7 = scmp.lt.s32.totalorder %s2912_s25, %s2912_s25 }
  0x4a   : > { %p2915_p3 = pnand %p2913_p2, %p3240_p1  ;;  %p2922_p9 = por %p2921_p7, %p2920_p6 }
  0x4c   : > { %p2916_p5 = pneg %p2915_p3 }
  0x4e   : > { %p2923_p12 = pnand %p2922_p9, %p2916_p5 }
  0x50   : > { %2926 = shalt.err (!%p2923_p12)
}
  0x51   : > { %2718 = dma.hbm_to_vmem [thread:$0]  (!%p3228_p13), %s3561_s4, 512, %s378_s16, [#allocation4], %s3077_s27, %s3077_s27, %s3078_s20  }
  0x52   : > { %s3079_s18 = smov [#allocation8]   ;;  %s3080_s30 = smov [#allocation9]  }
  0x53   : > { %s409_s15 = sshll.u32 %s3079_s18, 4  ;;  %s422_s21 = sshll.u32 %s3080_s30, 4  ;;  %s410_s15 = int_to_ptr.vmem [resolvable:$true] %s409_s15  ;;  %s423_s21 = int_to_ptr.vmem [resolvable:$true] %s422_s21 }
  0x54   : > { %s2927_s29 = scalar_lea.hbm %s3565_s8, 512 }
  0x55   : > { %p2928_p4 = scmp.ne.s32.totalorder %s3565_s8, %s2927_s29  ;;  %p2934_p11 = scmp.lt.u32.totalorder %s2927_s29, %s3565_s8 }
  0x57   : > { %p2930_p8 = pnand %p2928_p4, %p3240_p1 }
  0x59   : > { %p2931_p10 = pneg %p2930_p8 }
  0x5b   : > { %p2936_p0 = pnand %p2934_p11, %p2931_p10 }
  0x5d   : > { %2939 = shalt.err (!%p2936_p0)
}
  0x5e   : > { %s2940_s16 = scalar_lea.vmem %s410_s15, 512  ;;  %p2948_p6 = scmp.lt.s32.totalorder %s410_s15, %s410_s15 }
  0x5f   : > { %p2941_p2 = scmp.ne.s32.totalorder %s410_s15, %s2940_s16  ;;  %p2949_p7 = scmp.lt.s32.totalorder %s2940_s16, %s2940_s16 }
  0x61   : > { %p2943_p3 = pnand %p2941_p2, %p3240_p1  ;;  %p2950_p9 = por %p2949_p7, %p2948_p6 }
  0x63   : > { %p2944_p5 = pneg %p2943_p3 }
  0x65   : > { %p2951_p12 = pnand %p2950_p9, %p2944_p5 }
  0x67   : > { %2954 = shalt.err (!%p2951_p12)
}
  0x68   : > { %2724 = dma.hbm_to_vmem [thread:$0]  (!%p3228_p13), %s3565_s8, 512, %s410_s15, [#allocation7], %s3077_s27, %s3077_s27, %s3078_s20  }
  0x69   : > { %s2955_s30 = scalar_lea.hbm %s3566_s9, 512 }
  0x6a   : > { %p2956_p4 = scmp.ne.s32.totalorder %s3566_s9, %s2955_s30  ;;  %p2962_p11 = scmp.lt.u32.totalorder %s2955_s30, %s3566_s9 }
  0x6c   : > { %p2958_p8 = pnand %p2956_p4, %p3240_p1 }
  0x6e   : > { %p2959_p10 = pneg %p2958_p8 }
  0x70   : > { %p2964_p0 = pnand %p2962_p11, %p2959_p10 }
  0x72   : > { %2967 = shalt.err (!%p2964_p0)
}
  0x73   : > { %s2968_s12 = scalar_lea.vmem %s423_s21, 512  ;;  %p2976_p6 = scmp.lt.s32.totalorder %s423_s21, %s423_s21 }
  0x74   : > { %p2969_p2 = scmp.ne.s32.totalorder %s423_s21, %s2968_s12  ;;  %p2977_p7 = scmp.lt.s32.totalorder %s2968_s12, %s2968_s12 }
  0x76   : > { %p2971_p3 = pnand %p2969_p2, %p3240_p1  ;;  %p2978_p9 = por %p2977_p7, %p2976_p6 }
  0x78   : > { %p2972_p5 = pneg %p2971_p3 }
  0x7a   : > { %p2979_p12 = pnand %p2978_p9, %p2972_p5 }
  0x7c   : > { %2982 = shalt.err (!%p2979_p12)
}
  0x7d   : > { %2727 = dma.hbm_to_vmem [thread:$0]  (!%p3228_p13), %s3566_s9, 512, %s423_s21, [#allocation10], %s3077_s27, %s3077_s27, %s3078_s20  }
  0x7e   : > { %p3604_p4 = scmp.ne.s32.totalorder %s3599_s22, 0 }
  0x7f   : > { %p3605_p1 = scmp.ne.s32.totalorder (!%p3604_p4), %s3600_s23, 0 }
  0x80   : > { %468 = sbr.rel (%p3604_p4) target bundleno = 2629 (0xa45), region = 72 }
  0x87   : > { %3036 = dma.done.wait (%p3605_p1), [#allocation4], 512  }
  0x88   : > { %3038 = vsyncadd (%p3605_p1), [#allocation4], 4294966784 }
  0x89   : > { %3040 = dma.done.wait (%p3605_p1), [#allocation7], 1024  }
  0x8a   : > { %3042 = vsyncadd (%p3605_p1), [#allocation7], 4294966272 }
  0x8b   : > { %3044 = dma.done.wait (%p3605_p1), [#allocation10], 512  }
  0x8c   : > { %3046 = vsyncadd (%p3605_p1), [#allocation10], 4294966784  ;;  %p534_p13 = scmp.lt.s32.totalorder %s3065_s28, 1  ;;  %vm566_vm0 = vcmask 261120   ;;  %v555_v0 = vld [vmem:[#allocation3] sm:$0xff]  ;;  %v556_v1 = vld [vmem:[#allocation3 + $0x8] sm:$0xff] }
  0x8d   : > { %v557_v2 = vld [vmem:[#allocation3 + $0x10] sm:$0xff]  ;;  %v2601_v3 = vpack.c.bf16 %v556_v1, %v555_v0  ;;  %v558_v4 = vld [vmem:[#allocation3 + $0x18] sm:$0xff]  ;;  %v655_v9 = vld [vmem:[%s3559_s2 + $0x10] sm:$0xff]  ;;  %vm648_vm1 = vcmask 523264   ;;  %vm748_vm2 = vcmask 64512   ;;  %s3082_s24 = smov 120  }
  0x8e   : > { %s535_s22 = scalar_select %p534_p13, %s3065_s28, 1  ;;  %v2605_v6 = vpack.c.bf16 %v558_v4, %v557_v2  ;;  %v653_v7 = vld [vmem:[%s3559_s2] sm:$0xff]  ;;  %v654_v8 = vld [vmem:[%s3559_s2 + $0x8] sm:$0xff]  ;;  %v656_v11 = vld [vmem:[%s3559_s2 + $0x18] sm:$0xff]  ;;  %vm836_vm4 = vcmask 130048  }
  0x8f   : > { %2602 = vmatprep.subr.bf16.mxu0 %v2601_v3  ;;  %v2609_v10 = vpack.c.bf16 %v654_v8, %v653_v7  ;;  %v2613_v13 = vpack.c.bf16 %v656_v11, %v655_v9  ;;  %v2329_v16 = vld [vmem:[%s3562_s5] ss:$0 sm:$0xff]  ;;  %vm3380_vm3 = vmpackc.low %vm748_vm2, %vm748_vm2  ;;  %s3083_s27 = smov 88   ;;  %s3085_s21 = smov 104  }
  0x90   : > { %s2381_s19 = sshll.u32 %s535_s22, 4  ;;  %2604 = vmatpush3.bf16.msra.mxu0 %v2601_v3  ;;  %v2332_v20 = vld [vmem:[%s3560_s3] ss:$0 sm:$0xff]  ;;  %s3086_s6 = smov 80  }
  0x91   : > { %s547_s20 = scalar_lea.vmem %s3558_s1, %s2381_s19  ;;  %s541_s10 = scalar_lea.vmem %s3557_s0, %s2381_s19  ;;  %2606 = vmatprep.subr.bf16.mxu0 %v2605_v6  ;;  %2610 = vmatprep.subr.bf16.mxu1 %v2609_v10 }
  0x92   : > { %v553_v5 = vld [vmem:[%s547_s20] sm:$0xff]  ;;  %2612 = vmatpush3.bf16.msra.mxu1 %v2609_v10  ;;  %v554_v14 = vld [vmem:[%s547_s20 + $0x8] sm:$0xff]  ;;  %s3081_s19 = smov 96   ;;  %s3084_s20 = smov 112  }
  0x93   : > { %2470 = vmatprep.mubr.msk.f32.mxu0 %vm566_vm0, %v553_v5  ;;  %v3357_v12 = vld [vmem:[%s541_s10] sm:$0xff]  ;;  %2614 = vmatprep.subr.bf16.mxu1 %v2613_v13  ;;  %v3361_v15 = vld [vmem:[%s541_s10 + $0x8] sm:$0xff]  ;;  %s3087_s10 = smov 72   ;;  %s3608_s13 = sld [smem:[#allocation25_spill]] }
  0x94   : > { %2481 = vmatprep.mubr.msk.f32.mxu1 %vm566_vm0, %v3357_v12  ;;  %2608 = vmatpush3.bf16.msra.mxu0 %v2605_v6  ;;  %s530_s18 = sand.u32 1, %s3057_s26   ;;  %s3609_s29 = sld [smem:[#allocation26_spill]] }
  0x95   : > { %s2324_s30 = sshll.u32 %s530_s18, 4  ;;  %s3610_s25 = sld [smem:[#allocation21_spill]] }
  0x96   : > { %2616 = vmatpush3.bf16.msra.mxu1 %v2613_v13  ;;  %s2383_s12 = sshll.u32 %s3065_s28, 8  ;;  %s532_s15 = scalar_lea.vmem [#allocation11], %s2324_s30 }
  0x97   : > { %2471 = vmatmul.mubr.msk.f32.vlgmr.msra.gmra.mrb[0].mxu0 %vm566_vm0, %v554_v14  ;;  %s2179_s16 = sshll.u32 %s532_s15, 4  ;;  %s3511_s28 = scalar_lea.sflag [#allocation5], %s530_s18  ;;  %s3506_s16 = int_to_ptr.vmem [resolvable:$true] %s2179_s16 }
  0x99   : > { %2482 = vmatmul.mubr.msk.f32.vlgmr.msra.gmra.mrb[0].mxu1 %vm566_vm0, %v3361_v15 }
  0x9b   : > { %p3612_p10 = scmp.ne.s32.totalorder %s3610_s25, 0 }
 0x16a   : > { %v2472_v17 = vpop.f32.mrb[0].mxu0 }
 0x16b   : > { %v645_v18 = vadd.f32 %v2472_v17, %v2329_v16  ;;  %v639_v19 = vpop.f32.mrb[1].mxu0 }
 0x16c   : > { %v640_v21 = vadd.f32 %v2329_v16, %v639_v19  ;;  %v2483_v22 = vpop.f32.mrb[0].mxu1 }
 0x16d   : > { %650 = vst.msk [vmem:[#allocation2 + $0x8] sm:$0xff] %vm648_vm1, %v645_v18  ;;  %v737_v23 = vpop.f32.mrb[1].mxu1  ;;  %v743_v30 = vadd.f32 %v2483_v22, %v2332_v20 }
 0x16e   : > { %649 = vst.msk [vmem:[#allocation2] sm:$0xff] %vm648_vm1, %v640_v21  ;;  %v3374_v24 = vadd.f32 %v2332_v20, %v737_v23 }
 0x170   : > { %2488 = vmatprep.mubr.msk.f32.mxu0 %vm748_vm2, %v3374_v24 }
 0x174   : > { %v747_v25 = vld [vmem:[#allocation2 + $0x8] sm:$0xff] }
 0x175   : > { %v746_v26 = vld [vmem:[#allocation2] sm:$0xff] }
 0x176   : > { %v3384_v28 = vpack.i.bf16 %v747_v25, %v746_v26  ;;  %v2617_v29 = vpack.c.bf16 %v747_v25, %v746_v26  ;;  %v1147_v25 = vld [vmem:[#allocation6 + $0x8] sm:$0xff]  ;;  %v946_v26 = vld [vmem:[#allocation6] sm:$0xff] }
 0x178   : > { %2805 = vrot.lane.b32.xlu1 %v3384_v28, %s3081_s19  ;;  %2619 = vmatprep.subr.msk.bf16.mxu0 %vm3380_vm3, %v2617_v29 }
 0x179   : > { %2622 = vmatpush3.bf16.xpose.msk.msra.mxu0 %vm3380_vm3, %v2617_v29 }
 0x17a   : > { %2512 = vmatprep.subr.mxu0 %v1147_v25 }
 0x17c   : > { %2810 = vrot.lane.b32.xlu1 %v3384_v28, %s3082_s24 }
 0x180   : > { %949 = vrot.lane.b32.xlu1 %v743_v30, %s3082_s24  ;;  %2489 = vmatmul.mubr.msk.f32.vlgmr.msra.gmra.mrb[2].mxu0 %vm748_vm2, %v743_v30 }
 0x181   : > { %2513 = vmatpush3.msra.mxu0 %v1147_v25  ;;  %v1891_v25 = vld [vmem:[#allocation9] sm:$0xff] }
 0x182   : > { %2517 = vmatprep.subr.mxu0 %v946_v26 }
 0x184   : > { %2815 = vrot.lane.b32.xlu1 %v3384_v28, %s3083_s27 }
 0x1ea   : > { %v2806_v31 = vpop.permute.xlu1 %2805 }
 0x1eb   : > { %v2808_v32 = vunpack.i.h.bf16 %v2806_v31  ;;  %v2807_v33 = vunpack.i.l.bf16 %v2806_v31 }
 0x1ed   : > { %v2623_v34 = vpack.c.bf16 %v2808_v32, %v2807_v33 }
 0x1ee   : > { %v2811_v35 = vpop.permute.xlu1 %2810 }
 0x1ef   : > { %v2813_v36 = vunpack.i.h.bf16 %v2811_v35  ;;  %v2812_v37 = vunpack.i.l.bf16 %v2811_v35  ;;  %2624 = vmatprep.subr.bf16.mxu1 %v2623_v34 }
 0x1f0   : > { %2626 = vmatpush3.bf16.msra.mxu1 %v2623_v34 }
 0x1f1   : > { %v2627_v38 = vpack.c.bf16 %v2813_v36, %v2812_v37 }
 0x1f2   : > { %v950_v48 = vpop.permute.xlu1 %949 }
 0x1f3   : > { %2629 = vmatprep.subr.msk.bf16.mxu1 %vm3380_vm3, %v2627_v38 }
 0x1f6   : > { %v2816_v50 = vpop.permute.xlu1 %2815 }
 0x1f7   : > { %v2818_v52 = vunpack.i.h.bf16 %v2816_v50  ;;  %v2817_v53 = vunpack.i.l.bf16 %v2816_v50 }
 0x1f9   : > { %v2633_v55 = vpack.c.bf16 %v2818_v52, %v2817_v53 }
 0x253   : > { %v2490_v39 = vpop.f32.mrb[2].mxu0 }
 0x254   : > { %v827_v40 = vpop.f32.mrb[3].mxu0  ;;  %v840_v42 = vsel %vm836_vm4, %v2490_v39, -inf }
 0x255   : > { %v837_v41 = vsel %vm836_vm4, %v827_v40, -inf }
 0x256   : > { %838 = vmax.xlane.f32.xlu0 %v837_v41 }
 0x25a   : > { %841 = vmax.xlane.f32.xlu0 %v840_v42 }
 0x270   : > { %947 = vrot.lane.b32.xlu0 %v3374_v24, %s3082_s24  ;;  %s3611_s24 = sld [smem:[#allocation27_spill]] }
 0x276   : > { %s3504_s27 = scalar_lea.hbm %s3611_s24, %s2383_s12 }
 0x2e3   : > { %v839_v43 = vpop.xlane.xlu0 %838 }
 0x2e4   : > { %v843_v44 = vsub.f32 %v827_v40, %v839_v43 }
 0x2e6   : > { %v845_v45 = vmul.f32 1.442695, %v843_v44 }
 0x2e7   : > { %v842_v46 = vpop.xlane.xlu0 %841 }
 0x2e8   : > { %2839 = vpow2.f32 %v845_v45  ;;  %v844_v47 = vsub.f32 %v2490_v39, %v842_v46 }
 0x2ea   : > { %v847_v49 = vmul.f32 1.442695, %v844_v47 }
 0x2eb   : > { %v948_v56 = vpop.permute.xlu0 %947 }
 0x2ec   : > { %2841 = vpow2.f32 %v847_v49 }
 0x2f2   : > { %v2840_v51 = vpop.eup %2839 }
 0x2f3   : > { %2495 = vmatprep.mubr.msk.f32.mxu1 %vm836_vm4, %v2840_v51  ;;  %v849_v21 = vsel %vm836_vm4, %v2840_v51, 0.0 }
 0x2f6   : > { %v2842_v54 = vpop.eup %2841 }
 0x2f7   : > { %2496 = vmatmul.mubr.msk.f32.vlgmr.msra.gmra.mrb[2].mxu1 %vm836_vm4, %v2842_v54  ;;  %v852_v22 = vsel %vm836_vm4, %v2842_v54, 0.0 }
 0x2f8   : > { %2632 = vmatpush3.bf16.xpose.msk.msra.mxu1 %vm3380_vm3, %v2627_v38  ;;  %2502 = vmatprep.mubr.msk.f32.mxu1 %vm748_vm2, %v948_v56 }
 0x2f9   : > { %2634 = vmatprep.subr.bf16.mxu1 %v2633_v55 }
 0x2ff   : > { %2503 = vmatmul.mubr.msk.f32.vlgmr.msra.gmra.mrb[4].mxu1 %vm748_vm2, %v950_v48 }
 0x300   : > { %2636 = vmatpush3.bf16.msra.mxu1 %v2633_v55 }
 0x3ca   : > { %v3405_v57 = vpop.f32.mrb[2].mxu1 }
 0x3cb   : > { %v3407_v58 = vpop.f32.mrb[3].mxu1 }
 0x3d2   : > { %v2504_v59 = vpop.f32.mrb[4].mxu1 }
 0x3d3   : > { %v1029_v60 = vpop.f32.mrb[5].mxu1  ;;  %v1041_v61 = vsel %vm836_vm4, %v2504_v59, -inf }
 0x3d4   : > { %1042 = vmax.xlane.f32.xlu0 %v1041_v61  ;;  %v1038_v62 = vsel %vm836_vm4, %v1029_v60, -inf }
 0x3d5   : > { %1039 = vmax.xlane.f32.xlu1 %v1038_v62 }
 0x3e6   : > { %1310 = vrot.lane.b32.xlu1 %v3374_v24, %s3084_s20 }
 0x3ea   : > { %2820 = vrot.lane.b32.xlu0 %v3384_v28, %s3084_s20  ;;  %1312 = vrot.lane.b32.xlu1 %v743_v30, %s3084_s20  ;;  %s2983_s20 = scalar_lea.vmem %s3506_s16, 256 }
 0x3eb   : > { %p2984_p8 = scmp.ne.s32.totalorder %s3506_s16, %s2983_s20 }
 0x3ed   : > { %p2985_p11 = pnand %p2984_p8, %p3612_p10 }
 0x3ee   : > { %2825 = vrot.lane.b32.xlu1 %v3384_v28, %s3085_s21 }
 0x3ef   : > { %p2986_p0 = pneg %p2985_p11 }
 0x3f2   : > { %1594 = vrot.lane.b32.xlu1 %v3374_v24, %s3085_s21 }
 0x3f6   : > { %1596 = vrot.lane.b32.xlu1 %v743_v30, %s3085_s21  ;;  %s3088_s21 = smov [#allocation11]  }
 0x461   : > { %v1043_v63 = vpop.xlane.xlu0 %1042 }
 0x462   : > { %v1045_v0 = vsub.f32 %v2504_v59, %v1043_v63  ;;  %v1040_v1 = vpop.xlane.xlu1 %1039 }
 0x463   : > { %v1044_v2 = vsub.f32 %v1029_v60, %v1040_v1 }
 0x464   : > { %v1048_v3 = vmul.f32 1.442695, %v1045_v0 }
 0x465   : > { %v1046_v4 = vmul.f32 1.442695, %v1044_v2  ;;  %v2821_v5 = vpop.permute.xlu0 %2820 }
 0x466   : > { %2843 = vpow2.f32 %v1048_v3  ;;  %v2823_v6 = vunpack.i.h.bf16 %v2821_v5  ;;  %v2822_v7 = vunpack.i.l.bf16 %v2821_v5  ;;  %v1311_v8 = vpop.permute.xlu1 %1310 }
 0x467   : > { %2845 = vpow2.f32 %v1046_v4 }
 0x468   : > { %v2637_v9 = vpack.c.bf16 %v2823_v6, %v2822_v7  ;;  %v1510_v6 = vld [vmem:[#allocation6 + $0x10] sm:$0xff] }
 0x46a   : > { %2639 = vmatprep.subr.msk.bf16.mxu1 %vm3380_vm3, %v2637_v9  ;;  %v1313_v10 = vpop.permute.xlu1 %1312 }
 0x46e   : > { %v2826_v11 = vpop.permute.xlu1 %2825 }
 0x46f   : > { %v2828_v13 = vunpack.i.h.bf16 %v2826_v11  ;;  %v2827_v14 = vunpack.i.l.bf16 %v2826_v11 }
 0x470   : > { %v2844_v16 = vpop.eup %2843 }
 0x471   : > { %v2846_v17 = vpop.eup %2845  ;;  %v2647_v18 = vpack.c.bf16 %v2828_v13, %v2827_v14  ;;  %v1053_v19 = vsel %vm836_vm4, %v2844_v16, 0.0 }
 0x472   : > { %1054 = vadd.xlane.f32.xlu1 %v1053_v19  ;;  %2509 = vmatprep.mubr.msk.f32.mxu1 %vm836_vm4, %v2846_v17  ;;  %v1050_v20 = vsel %vm836_vm4, %v2846_v17, 0.0  ;;  %v1595_v23 = vpop.permute.xlu1 %1594 }
 0x473   : > { %2510 = vmatmul.mubr.msk.f32.vlgmr.msra.gmra.mrb[6].mxu1 %vm836_vm4, %v2844_v16  ;;  %1051 = vadd.xlane.f32.xlu0 %v1050_v20 }
 0x474   : > { %2642 = vmatpush3.bf16.xpose.msk.msra.mxu1 %vm3380_vm3, %v2637_v9  ;;  %2526 = vmatprep.mubr.msk.f32.mxu1 %vm748_vm2, %v1311_v8 }
 0x475   : > { %2649 = vmatprep.subr.msk.bf16.mxu1 %vm3380_vm3, %v2647_v18 }
 0x476   : > { %v1597_v24 = vpop.permute.xlu1 %1596 }
 0x477   : > { %850 = vadd.xlane.f32.xlu0 %v849_v21 }
 0x47b   : > { %2527 = vmatmul.mubr.msk.f32.vlgmr.msra.gmra.mrb[8].mxu1 %vm748_vm2, %v1313_v10  ;;  %853 = vadd.xlane.f32.xlu0 %v852_v22 }
 0x47c   : > { %2652 = vmatpush3.bf16.xpose.msk.msra.mxu1 %vm3380_vm3, %v2647_v18  ;;  %2545 = vmatprep.mubr.msk.f32.mxu1 %vm748_vm2, %v1595_v23 }
 0x483   : > { %2546 = vmatmul.mubr.msk.f32.vlgmr.msra.gmra.mrb[10].mxu1 %vm748_vm2, %v1597_v24  ;;  %v1794_v24 = vld [vmem:[#allocation6 + $0x18] sm:$0xff] }
 0x4ff   : > { %v1055_v31 = vpop.xlane.xlu1 %1054 }
 0x500   : > { %v1052_v29 = vpop.xlane.xlu0 %1051 }
 0x501   : > { %2847 = vrcp.f32 %v1052_v29 }
 0x504   : > { %v851_v30 = vpop.xlane.xlu0 %850 }
 0x505   : > { %2849 = vrcp.f32 %v851_v30 }
 0x506   : > { %2851 = vrcp.f32 %v1055_v31 }
 0x508   : > { %v854_v32 = vpop.xlane.xlu0 %853 }
 0x509   : > { %2853 = vrcp.f32 %v854_v32 }
 0x50b   : > { %v2848_v27 = vpop.eup %2847 }
 0x50f   : > { %v2850_v34 = vpop.eup %2849 }
 0x510   : > { %v2852_v36 = vpop.eup %2851  ;;  %v944_v39 = vmul.f32 %v2850_v34, %v3407_v58 }
 0x513   : > { %v2854_v40 = vpop.eup %2853 }
 0x514   : > { %v945_v45 = vmul.f32 %v2854_v40, %v3405_v57  ;;  %v1887_v40 = vld [vmem:[#allocation8] sm:$0xff] }
 0x546   : > { %v2511_v33 = vpop.f32.mrb[6].mxu1 }
 0x547   : > { %v1134_v35 = vpop.f32.mrb[7].mxu1  ;;  %v1146_v38 = vmul.f32 %v2852_v36, %v2511_v33 }
 0x548   : > { %v1145_v37 = vmul.f32 %v2848_v27, %v1134_v35 }
 0x54a   : > { %2514 = vmatprep.mubr.msk.f32.mxu0 %vm748_vm2, %v1145_v37  ;;  %v1893_v37 = vld [vmem:[#allocation9 + $0x10] sm:$0xff] }
 0x54b   : > { %2515 = vmatmul.mubr.msk.f32.vlgmr.msra.gmra.mrb[4].mxu0 %vm748_vm2, %v1146_v38  ;;  %v1894_v38 = vld [vmem:[#allocation9 + $0x18] sm:$0xff] }
 0x54c   : > { %2519 = vmatprep.mubr.msk.f32.mxu0 %vm748_vm2, %v944_v39  ;;  %2518 = vmatpush3.msra.mxu0 %v946_v26  ;;  %v1892_v26 = vld [vmem:[#allocation9 + $0x8] sm:$0xff]  ;;  %v2661_v39 = vpack.c.bf16 %v1894_v38, %v1893_v37 }
 0x54d   : > { %v2657_v29 = vpack.c.bf16 %v1892_v26, %v1891_v25 }
 0x54e   : > { %v2528_v41 = vpop.f32.mrb[8].mxu1 }
 0x54f   : > { %v1392_v42 = vpop.f32.mrb[9].mxu1  ;;  %v1404_v43 = vsel %vm836_vm4, %v2528_v41, -inf  ;;  %2658 = vmatprep.subr.bf16.mxu1 %v2657_v29 }
 0x550   : > { %1405 = vmax.xlane.f32.xlu0 %v1404_v43  ;;  %v1401_v44 = vsel %vm836_vm4, %v1392_v42, -inf  ;;  %2660 = vmatpush3.bf16.msra.mxu1 %v2657_v29  ;;  %v2062_v43 = vld [vmem:[%s3568_s11] sm:$0xff] }
 0x551   : > { %1402 = vmax.xlane.f32.xlu1 %v1401_v44  ;;  %2662 = vmatprep.subr.bf16.mxu1 %v2661_v39  ;;  %v2063_v44 = vld [vmem:[%s3568_s11 + $0x8] sm:$0xff] }
 0x553   : > { %2520 = vmatmul.mubr.msk.f32.vlgmr.msra.gmra.mrb[4].mxu0 %vm748_vm2, %v945_v45  ;;  %v2064_v45 = vld [vmem:[%s3568_s11 + $0x10] sm:$0xff] }
 0x554   : > { %2664 = vmatpush3.bf16.msra.mxu1 %v2661_v39 }
 0x556   : > { %v2547_v46 = vpop.f32.mrb[10].mxu1 }
 0x557   : > { %v1676_v47 = vpop.f32.mrb[11].mxu1  ;;  %v1688_v48 = vsel %vm836_vm4, %v2547_v46, -inf }
 0x558   : > { %1689 = vmax.xlane.f32.xlu0 %v1688_v48  ;;  %v1685_v49 = vsel %vm836_vm4, %v1676_v47, -inf }
 0x55c   : > { %1686 = vmax.xlane.f32.xlu0 %v1685_v49  ;;  %v2066_v49 = vld [vmem:[%s3568_s11 + $0x20] sm:$0xff] }
 0x562   : > { %2830 = vrot.lane.b32.xlu1 %v3384_v28, %s3086_s6  ;;  %s2987_s6 = sshll.u32 %s3088_s21, 4  ;;  %s2988_s6 = int_to_ptr.vmem [resolvable:$false] %s2987_s6 }
 0x563   : > { %p2990_p2 = scmp.lt.s32.totalorder %s3506_s16, %s2988_s6 }
 0x5dd   : > { %v1406_v50 = vpop.xlane.xlu0 %1405 }
 0x5de   : > { %v1408_v51 = vsub.f32 %v2528_v41, %v1406_v50  ;;  %v1403_v52 = vpop.xlane.xlu1 %1402  ;;  %v1888_v41 = vld [vmem:[#allocation8 + $0x8] sm:$0xff]  ;;  %v2067_v50 = vld [vmem:[%s3568_s11 + $0x28] sm:$0xff] }
 0x5df   : > { %v1407_v53 = vsub.f32 %v1392_v42, %v1403_v52  ;;  %v2665_v42 = vpack.c.bf16 %v1888_v41, %v1887_v40  ;;  %v2367_v52 = vld [vmem:[%s3564_s7] ss:$0 sm:$0xff] }
 0x5e0   : > { %v1411_v54 = vmul.f32 1.442695, %v1408_v51  ;;  %v2681_v51 = vpack.c.bf16 %v2067_v50, %v2066_v49 }
 0x5e1   : > { %v1409_v55 = vmul.f32 1.442695, %v1407_v53  ;;  %2666 = vmatprep.subr.bf16.mxu1 %v2665_v42 }
 0x5e2   : > { %2855 = vpow2.f32 %v1411_v54  ;;  %v2831_v56 = vpop.permute.xlu1 %2830  ;;  %v1889_v54 = vld [vmem:[#allocation8 + $0x10] sm:$0xff] }
 0x5e3   : > { %2857 = vpow2.f32 %v1409_v55  ;;  %v2833_v57 = vunpack.i.h.bf16 %v2831_v56  ;;  %v2832_v58 = vunpack.i.l.bf16 %v2831_v56  ;;  %v1890_v55 = vld [vmem:[#allocation8 + $0x18] sm:$0xff] }
 0x5e5   : > { %v2643_v59 = vpack.c.bf16 %v2833_v57, %v2832_v58  ;;  %v1690_v60 = vpop.xlane.xlu0 %1689 }
 0x5e6   : > { %v1692_v7 = vsub.f32 %v2547_v46, %v1690_v60  ;;  %v2673_v46 = vpack.c.bf16 %v2063_v44, %v2062_v43  ;;  %v2068_v60 = vld [vmem:[%s3568_s11 + $0x30] sm:$0xff] }
 0x5e7   : > { %2644 = vmatprep.subr.bf16.mxu0 %v2643_v59 }
 0x5e8   : > { %2646 = vmatpush3.bf16.msra.mxu0 %v2643_v59  ;;  %v1695_v8 = vmul.f32 1.442695, %v1692_v7  ;;  %v2669_v59 = vpack.c.bf16 %v1890_v55, %v1889_v54 }
 0x5e9   : > { %v1687_v61 = vpop.xlane.xlu0 %1686  ;;  %2536 = vmatprep.subr.mxu0 %v1510_v6 }
 0x5ea   : > { %v1691_v62 = vsub.f32 %v1676_v47, %v1687_v61  ;;  %v2065_v47 = vld [vmem:[%s3568_s11 + $0x18] sm:$0xff] }
 0x5eb   : > { %v2677_v48 = vpack.c.bf16 %v2065_v47, %v2064_v45  ;;  %v2069_v61 = vld [vmem:[%s3568_s11 + $0x38] sm:$0xff] }
 0x5ec   : > { %v2856_v63 = vpop.eup %2855  ;;  %v1693_v0 = vmul.f32 1.442695, %v1691_v62  ;;  %v2685_v62 = vpack.c.bf16 %v2069_v61, %v2068_v60 }
 0x5ed   : > { %v2858_v1 = vpop.eup %2857  ;;  %v1416_v2 = vsel %vm836_vm4, %v2856_v63, 0.0 }
 0x5ee   : > { %2859 = vpow2.f32 %v1693_v0  ;;  %2533 = vmatprep.mubr.msk.f32.mxu0 %vm836_vm4, %v2858_v1  ;;  %1417 = vadd.xlane.f32.xlu0 %v1416_v2  ;;  %v1413_v3 = vsel %vm836_vm4, %v2858_v1, 0.0 }
 0x5ef   : > { %2534 = vmatmul.mubr.msk.f32.vlgmr.msra.gmra.mrb[6].mxu0 %vm836_vm4, %v2856_v63  ;;  %2861 = vpow2.f32 %v1695_v8  ;;  %v2372_v63 = vld [vmem:[%s3608_s13] ss:$0 sm:$0xff] }
 0x5f0   : > { %2537 = vmatpush3.msra.mxu0 %v1510_v6  ;;  %v2373_v6 = vld [vmem:[%s3609_s29] ss:$0 sm:$0xff] }
 0x5f2   : > { %1414 = vadd.xlane.f32.xlu0 %v1413_v3 }
 0x5f8   : > { %v2860_v4 = vpop.eup %2859 }
 0x5f9   : > { %v1697_v5 = vsel %vm836_vm4, %v2860_v4, 0.0  ;;  %v2862_v9 = vpop.eup %2861 }
 0x5fa   : > { %1698 = vadd.xlane.f32.xlu1 %v1697_v5  ;;  %v1700_v10 = vsel %vm836_vm4, %v2862_v9, 0.0 }
 0x608   : > { %2835 = vrot.lane.b32.xlu0 %v3384_v28, %s3087_s10  ;;  %s2989_s10 = scalar_lea.vmem %s2988_s6, 512 }
 0x609   : > { %p2991_p3 = scmp.lt.s32.totalorder %s2989_s10, %s2983_s20 }
 0x60b   : > { %p2992_p5 = por %p2991_p3, %p2990_p2 }
 0x60d   : > { %p2993_p6 = pnand %p2992_p5, %p2986_p0 }
 0x627   : > { %1701 = vadd.xlane.f32.xlu0 %v1700_v10 }
 0x67b   : > { %v1418_v11 = vpop.xlane.xlu0 %1417 }
 0x67f   : > { %v1415_v13 = vpop.xlane.xlu0 %1414 }
 0x680   : > { %2863 = vrcp.f32 %v1415_v13 }
 0x681   : > { %2865 = vrcp.f32 %v1418_v11 }
 0x683   : > { %v2836_v14 = vpop.permute.xlu0 %2835 }
 0x684   : > { %v2838_v16 = vunpack.i.h.bf16 %v2836_v14  ;;  %v2837_v17 = vunpack.i.l.bf16 %v2836_v14 }
 0x686   : > { %v2653_v18 = vpack.c.bf16 %v2838_v16, %v2837_v17 }
 0x687   : > { %v1699_v30 = vpop.xlane.xlu1 %1698 }
 0x688   : > { %2654 = vmatprep.subr.bf16.mxu0 %v2653_v18  ;;  %2867 = vrcp.f32 %v1699_v30 }
 0x68a   : > { %v2864_v20 = vpop.eup %2863 }
 0x68b   : > { %v2866_v28 = vpop.eup %2865 }
 0x692   : > { %v2868_v27 = vpop.eup %2867 }
 0x6b4   : > { %v1702_v31 = vpop.xlane.xlu0 %1701 }
 0x6b5   : > { %2869 = vrcp.f32 %v1702_v31 }
 0x6bf   : > { %v2870_v34 = vpop.eup %2869 }
 0x6c2   : > { %v2535_v19 = vpop.f32.mrb[6].mxu0 }
 0x6c3   : > { %v1497_v21 = vpop.f32.mrb[7].mxu0  ;;  %v1509_v23 = vmul.f32 %v2866_v28, %v2535_v19 }
 0x6c4   : > { %v1508_v22 = vmul.f32 %v2864_v20, %v1497_v21 }
 0x6c6   : > { %2538 = vmatprep.mubr.msk.f32.mxu0 %vm748_vm2, %v1508_v22 }
 0x6c7   : > { %2539 = vmatmul.mubr.msk.f32.vlgmr.msra.gmra.mrb[4].mxu0 %vm748_vm2, %v1509_v23 }
 0x6c8   : > { %2656 = vmatpush3.bf16.msra.mxu0 %v2653_v18  ;;  %2552 = vmatprep.mubr.msk.f32.mxu0 %vm836_vm4, %v2860_v4 }
 0x6c9   : > { %2555 = vmatprep.subr.mxu0 %v1794_v24 }
 0x6cb   : > { %2553 = vmatmul.mubr.msk.f32.vlgmr.msra.gmra.mrb[8].mxu0 %vm836_vm4, %v2862_v9 }
 0x6cc   : > { %2556 = vmatpush3.msra.mxu0 %v1794_v24 }
 0x6cd   : > { %2674 = vmatprep.subr.bf16.mxu0 %v2673_v46 }
 0x79e   : > { %v2554_v32 = vpop.f32.mrb[8].mxu0 }
 0x79f   : > { %v1781_v33 = vpop.f32.mrb[9].mxu0  ;;  %v1793_v36 = vmul.f32 %v2870_v34, %v2554_v32 }
 0x7a0   : > { %v1792_v35 = vmul.f32 %v2868_v27, %v1781_v33 }
 0x7a2   : > { %2557 = vmatprep.mubr.msk.f32.mxu0 %vm748_vm2, %v1792_v35 }
 0x7a3   : > { %2558 = vmatmul.mubr.msk.f32.vlgmr.msra.gmra.mrb[4].mxu0 %vm748_vm2, %v1793_v36 }
 0x7a4   : > { %2676 = vmatpush3.bf16.msra.mxu0 %v2673_v46 }
 0x7a5   : > { %2678 = vmatprep.subr.bf16.mxu0 %v2677_v48 }
 0x7a8   : > { %2680 = vmatpush3.bf16.msra.mxu0 %v2677_v48 }
 0x7a9   : > { %2682 = vmatprep.subr.bf16.mxu0 %v2681_v51 }
 0x7ac   : > { %2684 = vmatpush3.bf16.msra.mxu0 %v2681_v51 }
 0x7ad   : > { %2686 = vmatprep.subr.bf16.mxu0 %v2685_v62 }
 0x7b0   : > { %2688 = vmatpush3.bf16.msra.mxu0 %v2685_v62 }
 0x876   : > { %v2559_v53 = vpop.f32.mrb[4].mxu0 }
 0x877   : > { %v1867_v56 = vpop.f32.mrb[5].mxu0  ;;  %v1886_v58 = vadd.f32 %v2559_v53, %v2367_v52 }
 0x878   : > { %v1885_v57 = vadd.f32 %v2367_v52, %v1867_v56 }
 0x87a   : > { %2568 = vmatprep.mubr.msk.f32.mxu1 %vm566_vm0, %v1885_v57 }
 0x87b   : > { %2569 = vmatmul.mubr.msk.f32.vlgmr.msra.gmra.mrb[12].mxu1 %vm566_vm0, %v1886_v58 }
 0x87c   : > { %2668 = vmatpush3.bf16.msra.mxu1 %v2665_v42  ;;  %2579 = vmatprep.mubr.msk.f32.mxu1 %vm566_vm0, %v3357_v12 }
 0x87d   : > { %2670 = vmatprep.subr.bf16.mxu1 %v2669_v59 }
 0x880   : > { %2672 = vmatpush3.bf16.msra.mxu1 %v2669_v59 }
 0x883   : > { %2580 = vmatmul.mubr.msk.f32.vlgmr.msra.gmra.mrb[12].mxu1 %vm566_vm0, %v3361_v15 }
 0x956   : > { %v2581_v0 = vpop.f32.mrb[12].mxu1 }
 0x957   : > { %v2059_v1 = vadd.f32 %v2581_v0, %v2372_v63  ;;  %v2042_v2 = vpop.f32.mrb[13].mxu1 }
 0x958   : > { %v2058_v3 = vadd.f32 %v2372_v63, %v2042_v2 }
 0x959   : > { %v2061_v5 = vmax.f32 %v2059_v1, 0.0 }
 0x95a   : > { %v2060_v4 = vmax.f32 %v2058_v3, 0.0 }
 0x95c   : > { %2598 = vmatprep.mubr.msk.f32.mxu0 %vm648_vm1, %v2060_v4 }
 0x95d   : > { %2599 = vmatmul.mubr.msk.f32.vlgmr.msra.gmra.mrb[10].mxu0 %vm648_vm1, %v2061_v5 }
 0xa30   : > { %v2600_v7 = vpop.f32.mrb[10].mxu0 }
 0xa31   : > { %v2156_v8 = vadd.f32 %v2600_v7, %v2373_v6  ;;  %v2150_v9 = vpop.f32.mrb[11].mxu0 }
 0xa32   : > { %v2151_v10 = vadd.f32 %v2373_v6, %v2150_v9 }
 0xa33   : > { %v2160_v11 = vadd.f32 %v2156_v8, %v3361_v15 }
 0xa34   : > { %v2159_v13 = vadd.f32 %v2151_v10, %v3357_v12 }
 0xa35   : > { %2162 = vst.msk [vmem:[%s532_s15 + $0x8] sm:$0xff] %vm566_vm0, %v2160_v11 }
 0xa36   : > { %2161 = vst.msk [vmem:[%s532_s15] sm:$0xff] %vm566_vm0, %v2159_v13 }
 0xa37   : > { %2996 = shalt.err (!%p2993_p6)
}
 0xa38   : > { %s2997_s23 = scalar_lea.hbm %s3504_s27, 256  ;;  %s3001_s30 = scalar_lea.hbm %s3611_s24, 512 }
 0xa39   : > { %p2998_p7 = scmp.ne.s32.totalorder %s3504_s27, %s2997_s23  ;;  %p3002_p4 = scmp.lt.u32.totalorder %s3504_s27, %s3611_s24 }
 0xa3a   : > { %p3003_p1 = scmp.lt.u32.totalorder %s3001_s30, %s2997_s23  ;;  %p3005_p8 = scmp.lt.u32.totalorder %s2997_s23, %s3504_s27 }
 0xa3b   : > { %p2999_p9 = pnand %p2998_p7, %p3612_p10 }
 0xa3c   : > { %p3004_p13 = por %p3003_p1, %p3002_p4 }
 0xa3d   : > { %p3000_p12 = pneg %p2999_p9 }
 0xa3e   : > { %p3006_p11 = por %p3005_p8, %p3004_p13 }
 0xa40   : > { %p3007_p0 = pnand %p3006_p11, %p3000_p12 }
 0xa42   : > { %3010 = shalt.err (!%p3007_p0)
}
 0xa43   : > { %s3089_s29 = smov 128   ;;  %s3090_s12 = smov 8  }
 0xa44   : > { %2713 = dma.vmem_to_hbm [thread:$0]  (%p3612_p10), %s3506_s16, 256, %s3504_s27, %s3511_s28, %s3089_s29, %s3089_s29, %s3090_s12  }
 0xa45 PF: > { %s3613_s15 = sld [smem:[#allocation19_spill]]  ;;  %s3614_s22 = sld [smem:[#allocation16_spill]] }
 0xa46   : > { %s3615_s19 = sld [smem:[#allocation22_spill]] }
 0xa4b   : > { %p2740_p2 = scmp.ge.s32.totalorder %s3613_s15, 2  ;;  %s2194_s20 = sand.u32 1, %s3614_s22  }
 0xa4c   : > { %p3616_p3 = scmp.ne.s32.totalorder %s3615_s19, 0  ;;  %s2195_s21 = scalar_lea.sflag [#allocation5], %s2194_s20 }
 0xa4e   : > { %p2729_p5 = pnand %p2740_p2, %p3616_p3 }
 0xa50   : > { %3048 = dma.done.wait (!%p2729_p5), %s2195_s21, 256  }
 0xa51   : > { %3050 = vsyncadd (!%p2729_p5), %s2195_s21, 4294967040  ;;  %s29_s30 = sadd.s32 1, %s3613_s15   ;;  %s3617_s6 = sld [smem:[#allocation17_spill]] }
 0xa52   : > { %p26_p6 = scmp.ge.s32.totalorder %s29_s30, 4   ;;  %s3618_s27 = sld [smem:[#allocation23_spill]] }
 0xa53   : > { %s3619_s28 = sld [smem:[#allocation18_spill]]  ;;  %s3620_s29 = sld [smem:[#allocation20_spill]] }
 0xa54   : > { %s3621_s25 = smov %s3057_s26  ;;  %28 = sbr.rel (!%p26_p6) target bundleno = 12 (0xc), region = 131 }
 0xa57   : > { %s3622_s26 = smov %s3617_s6 }
 0xa5b   :  { %2200 = vsyncpa [#allocation4], 1 }
 0xa5c   :  { %2202 = vsyncpa [#allocation4 + $0x1], 1 }
 0xa5d   :  { %2203 = vsyncpa [#allocation7], 1 }
 0xa5e   :  { %2204 = vsyncpa [#allocation10], 1 }
 0xa5f   :  { %2205 = vsyncpa [#allocation5], 1 }
 0xa60   :  { %2207 = vsyncpa [#allocation5 + $0x1], 1 }

</bundles_post_ra>
